<compile_context>
chip_gen: v5e
topology: v5e:2x2
jax: 0.10.0
libtpu: 0.0.40
codegen_flags: <defaults>
</compile_context>

<pallas_src>
import jax
import jax.numpy as jnp
from jax.experimental import pallas as pl
from jax.experimental.pallas import tpu as pltpu

_LANE = 128
_SUBLANE = 8
_MAX_ROWS = 8192  # sublane rows per chunk -> 4 MiB per f32 input block


def _dice_partial_kernel(logits_ref, targets_ref, inter_ref, union_ref):
    # logits_ref / targets_ref: (1, G, 8, 128) tile of one batch row.
    # inter_ref / union_ref:    (1, 8, 128) per-batch accumulators (outputs are
    #                           resident across the reduction grid axis).
    j = pl.program_id(1)

    @pl.when(j == 0)
    def _():
        inter_ref[...] = jnp.zeros_like(inter_ref)
        union_ref[...] = jnp.zeros_like(union_ref)

    logits = logits_ref[0].astype(jnp.float32)    # (G, 8, 128)
    targets = targets_ref[0].astype(jnp.float32)  # (G, 8, 128)
    probs = jax.nn.sigmoid(logits)                # EUP

    # Leading-axis sums lower to plain vreg adds (VPU); the single cross-lane
    # reduce happens once, in the JAX wrapper.
    inter_ref[...] += jnp.sum(probs * targets, axis=0, keepdims=True)
    union_ref[...] += jnp.sum(probs + targets, axis=0, keepdims=True)


def _round_up(x, m):
    return ((x + m - 1) // m) * m


def dice_loss(logits, targets, smooth=1e-6):
    """Pallas TPU implementation of DiceLoss.forward (returns f32 scalar)."""
    assert logits.shape == targets.shape
    b = logits.shape[0]
    n = 1
    for d in logits.shape[1:]:
        n *= d

    logits2d = logits.reshape(b, n)
    targets2d = targets.reshape(b, n)

    # Sublane rows per chunk: as many as fit a ~4 MiB f32 block, multiple of 8.
    rows = min(_MAX_ROWS, _round_up(pl.cdiv(n, _LANE), _SUBLANE))
    chunk = rows * _LANE
    num_chunks = pl.cdiv(n, chunk)
    n_pad = num_chunks * chunk

    if n_pad != n:
        pad = n_pad - n
        # sigmoid(-1e9) == 0 exactly in f32, so padded columns add nothing to
        # intersection or union.
        logits2d = jnp.pad(logits2d, ((0, 0), (0, pad)), constant_values=-1e9)
        targets2d = jnp.pad(targets2d, ((0, 0), (0, pad)), constant_values=0)

    g = rows // _SUBLANE
    logits4d = logits2d.reshape(b, num_chunks * g, _SUBLANE, _LANE)
    targets4d = targets2d.reshape(b, num_chunks * g, _SUBLANE, _LANE)

    in_spec = pl.BlockSpec((1, g, _SUBLANE, _LANE), lambda i, j: (i, j, 0, 0))
    out_spec = pl.BlockSpec((1, _SUBLANE, _LANE), lambda i, j: (i, 0, 0))

    bytes_accessed = (
        logits4d.size * logits4d.dtype.itemsize
        + targets4d.size * targets4d.dtype.itemsize
        + 2 * b * _SUBLANE * _LANE * 4
    )

    inter, union = pl.pallas_call(
        _dice_partial_kernel,
        out_shape=(
            jax.ShapeDtypeStruct((b, _SUBLANE, _LANE), jnp.float32),
            jax.ShapeDtypeStruct((b, _SUBLANE, _LANE), jnp.float32),
        ),
        grid_spec=pltpu.PrefetchScalarGridSpec(
            num_scalar_prefetch=0,
            grid=(b, num_chunks),
            in_specs=[in_spec, in_spec],
            out_specs=(out_spec, out_spec),
        ),
        compiler_params=pltpu.CompilerParams(
            dimension_semantics=("parallel", "arbitrary"),
            vmem_limit_bytes=40 << 20,
        ),
        cost_estimate=pl.CostEstimate(
            flops=5 * b * n_pad,
            transcendentals=b * n_pad,
            bytes_accessed=bytes_accessed,
        ),
    )(logits4d, targets4d)

    # O(B) finalize in plain JAX: cross-lane reduce of lane-dense partials,
    # then dice / mean (matches torch semantics).
    inter = jnp.sum(inter, axis=(1, 2))   # (B,)
    union = jnp.sum(union, axis=(1, 2))   # (B,)
    dice = (2.0 * inter + smooth) / (union + smooth)
    return 1.0 - jnp.mean(dice)


def dice_loss_ref(logits, targets, smooth=1e-6):
    probs = jax.nn.sigmoid(logits).astype(jnp.float32)
    targets = targets.astype(jnp.float32)
    b = probs.shape[0]
    probs = probs.reshape(b, -1)
    targets = targets.reshape(b, -1)
    inter = jnp.sum(probs * targets, axis=1)
    union = jnp.sum(probs, axis=1) + jnp.sum(targets, axis=1)
    dice = (2.0 * inter + smooth) / (union + smooth)
    return 1.0 - jnp.mean(dice)


if __name__ == "__main__":
    key = jax.random.PRNGKey(0)
    k1, k2 = jax.random.split(key)

    # Small NCHW shapes: batch=2, channels=4, spatial=16x16 (N divisible by 128).
    logits = jax.random.normal(k1, (2, 4, 16, 16), dtype=jnp.float32)
    targets = (jax.random.uniform(k2, (2, 4, 16, 16)) > 0.5).astype(jnp.float32)

    out = dice_loss(logits, targets)
    jax.block_until_ready(out)
    ref = dice_loss_ref(logits, targets)
    assert jnp.allclose(out, ref, atol=1e-5, rtol=1e-5), (out, ref)

    # Also exercise the padded path (N not a multiple of 128).
    k3, k4 = jax.random.split(k2)
    logits2 = jax.random.normal(k3, (3, 3, 17, 19), dtype=jnp.float32)
    targets2 = (jax.random.uniform(k4, (3, 3, 17, 19)) > 0.5).astype(jnp.float32)
    out2 = dice_loss(logits2, targets2)
    jax.block_until_ready(out2)
    ref2 = dice_loss_ref(logits2, targets2)
    assert jnp.allclose(out2, ref2, atol=1e-5, rtol=1e-5), (out2, ref2)

    print("KERNEL_OK")
</pallas_src>

<mosaic_0001>
module attributes {stable_mosaic.version = 11 : i64} {
  func.func @_dice_partial_kernel(%arg0: i32, %arg1: i32, %arg2: memref<1x1x8x128xf32, #tpu.memory_space<vmem>>, %arg3: memref<1x1x8x128xf32, #tpu.memory_space<vmem>>, %arg4: memref<1x8x128xf32, #tpu.memory_space<vmem>>, %arg5: memref<1x8x128xf32, #tpu.memory_space<vmem>>) attributes {dimension_semantics = [#tpu.dimension_semantics<parallel>, #tpu.dimension_semantics<arbitrary>], iteration_bounds = array<i64: 2, 1>, scalar_prefetch = 0 : i64, scratch_operands = 0 : i64, tpu.core_type = #tpu.core_type<tc>, window_params = [{transform_indices = @transform_0, window_bounds = array<i64: 1, 1, 8, 128>}, {transform_indices = @transform_1, window_bounds = array<i64: 1, 1, 8, 128>}, {transform_indices = @transform_2, window_bounds = array<i64: 1, 8, 128>}, {transform_indices = @transform_3, window_bounds = array<i64: 1, 8, 128>}]} {
    %c0_i32 = arith.constant 0 : i32
    %0 = arith.cmpi eq, %arg1, %c0_i32 : i32
    %1 = arith.extui %0 : i1 to i32
    %c0_i32_0 = arith.constant 0 : i32
    %2 = arith.cmpi ne, %1, %c0_i32_0 : i32
    scf.if %2 {
      %cst_22 = arith.constant 0.000000e+00 : f32
      %24 = vector.broadcast %cst_22 : f32 to vector<1x8x128xf32>
      %c0_23 = arith.constant 0 : index
      %c0_24 = arith.constant 0 : index
      %c0_25 = arith.constant 0 : index
      %25 = vector.load %arg4[%c0_23, %c0_24, %c0_25] : memref<1x8x128xf32, #tpu.memory_space<vmem>>, vector<1x8x128xf32>
      tpu.vector_store %arg4[%c0_23, %c0_24, %c0_25], %24 {strides = array<i32>} : memref<1x8x128xf32, #tpu.memory_space<vmem>>, vector<1x8x128xf32>,
      %cst_26 = arith.constant 0.000000e+00 : f32
      %26 = vector.broadcast %cst_26 : f32 to vector<1x8x128xf32>
      %c0_27 = arith.constant 0 : index
      %c0_28 = arith.constant 0 : index
      %c0_29 = arith.constant 0 : index
      %27 = vector.load %arg5[%c0_27, %c0_28, %c0_29] : memref<1x8x128xf32, #tpu.memory_space<vmem>>, vector<1x8x128xf32>
      tpu.vector_store %arg5[%c0_27, %c0_28, %c0_29], %26 {strides = array<i32>} : memref<1x8x128xf32, #tpu.memory_space<vmem>>, vector<1x8x128xf32>,
    } else {
    }
    %c0 = arith.constant 0 : index
    %c0_1 = arith.constant 0 : index
    %c0_2 = arith.constant 0 : index
    %c0_3 = arith.constant 0 : index
    %3 = vector.load %arg2[%c0, %c0_1, %c0_2, %c0_3] : memref<1x1x8x128xf32, #tpu.memory_space<vmem>>, vector<1x1x8x128xf32>
    %4 = vector.shape_cast %3 : vector<1x1x8x128xf32> to vector<1x8x128xf32>
    %c0_4 = arith.constant 0 : index
    %c0_5 = arith.constant 0 : index
    %c0_6 = arith.constant 0 : index
    %c0_7 = arith.constant 0 : index
    %5 = vector.load %arg3[%c0_4, %c0_5, %c0_6, %c0_7] : memref<1x1x8x128xf32, #tpu.memory_space<vmem>>, vector<1x1x8x128xf32>
    %6 = vector.shape_cast %5 : vector<1x1x8x128xf32> to vector<1x8x128xf32>
    %7 = arith.negf %4 : vector<1x8x128xf32>
    %8 = math.exp %7 : vector<1x8x128xf32>
    %cst = arith.constant 1.000000e+00 : f32
    %9 = vector.broadcast %cst : f32 to vector<1x8x128xf32>
    %10 = arith.addf %9, %8 : vector<1x8x128xf32>
    %11 = arith.divf %9, %10 : vector<1x8x128xf32>
    %c0_8 = arith.constant 0 : index
    %c0_9 = arith.constant 0 : index
    %c0_10 = arith.constant 0 : index
    %12 = vector.load %arg4[%c0_8, %c0_9, %c0_10] : memref<1x8x128xf32, #tpu.memory_space<vmem>>, vector<1x8x128xf32>
    %13 = arith.mulf %11, %6 : vector<1x8x128xf32>
    %cst_11 = arith.constant dense<0.000000e+00> : vector<8x128xf32>
    %14 = vector.multi_reduction <add>, %13, %cst_11 [0] : vector<1x8x128xf32> to vector<8x128xf32>
    %15 = vector.shape_cast %14 : vector<8x128xf32> to vector<1x8x128xf32>
    %16 = arith.addf %12, %15 : vector<1x8x128xf32>
    %c0_12 = arith.constant 0 : index
    %c0_13 = arith.constant 0 : index
    %c0_14 = arith.constant 0 : index
    %17 = vector.load %arg4[%c0_12, %c0_13, %c0_14] : memref<1x8x128xf32, #tpu.memory_space<vmem>>, vector<1x8x128xf32>
    tpu.vector_store %arg4[%c0_12, %c0_13, %c0_14], %16 {strides = array<i32>} : memref<1x8x128xf32, #tpu.memory_space<vmem>>, vector<1x8x128xf32>,
    %c0_15 = arith.constant 0 : index
    %c0_16 = arith.constant 0 : index
    %c0_17 = arith.constant 0 : index
    %18 = vector.load %arg5[%c0_15, %c0_16, %c0_17] : memref<1x8x128xf32, #tpu.memory_space<vmem>>, vector<1x8x128xf32>
    %19 = arith.addf %11, %6 : vector<1x8x128xf32>
    %cst_18 = arith.constant dense<0.000000e+00> : vector<8x128xf32>
    %20 = vector.multi_reduction <add>, %19, %cst_18 [0] : vector<1x8x128xf32> to vector<8x128xf32>
    %21 = vector.shape_cast %20 : vector<8x128xf32> to vector<1x8x128xf32>
    %22 = arith.addf %18, %21 : vector<1x8x128xf32>
    %c0_19 = arith.constant 0 : index
    %c0_20 = arith.constant 0 : index
    %c0_21 = arith.constant 0 : index
    %23 = vector.load %arg5[%c0_19, %c0_20, %c0_21] : memref<1x8x128xf32, #tpu.memory_space<vmem>>, vector<1x8x128xf32>
    tpu.vector_store %arg5[%c0_19, %c0_20, %c0_21], %22 {strides = array<i32>} : memref<1x8x128xf32, #tpu.memory_space<vmem>>, vector<1x8x128xf32>,
    return
  }
  func.func @transform_0(%arg0: i32, %arg1: i32) -> (i32, i32, i32, i32) {
    %c0_i32 = arith.constant 0 : i32
    %c0_i32_0 = arith.constant 0 : i32
    %c0_i32_1 = arith.constant 0 : i32
    return %arg0, %arg1, %c0_i32, %c0_i32_0 : i32, i32, i32, i32
  }
  func.func @transform_1(%arg0: i32, %arg1: i32) -> (i32, i32, i32, i32) {
    %c0_i32 = arith.constant 0 : i32
    %c0_i32_0 = arith.constant 0 : i32
    %c0_i32_1 = arith.constant 0 : i32
    return %arg0, %arg1, %c0_i32, %c0_i32_0 : i32, i32, i32, i32
  }
  func.func @transform_2(%arg0: i32, %arg1: i32) -> (i32, i32, i32) {
    %c0_i32 = arith.constant 0 : i32
    %c0_i32_0 = arith.constant 0 : i32
    %c0_i32_1 = arith.constant 0 : i32
    return %arg0, %c0_i32, %c0_i32_0 : i32, i32, i32
  }
  func.func @transform_3(%arg0: i32, %arg1: i32) -> (i32, i32, i32) {
    %c0_i32 = arith.constant 0 : i32
    %c0_i32_0 = arith.constant 0 : i32
    %c0_i32_1 = arith.constant 0 : i32
    return %arg0, %c0_i32, %c0_i32_0 : i32, i32, i32
  }
}

</mosaic_0001>

<bundles_post_ra>
// kernel: tpu_custom_call.1
= control target key start
LH: loop header
LB: loop body
LE: loop exit
PB: predicated region body
PF: predicated region fallthrough
CT: control target
= control target key end

     0   :  { %9 = vsyncpa [#allocation3], 0  ;;  %s921_s0 = inlined_call_operand.hbm [shape: f32[2,1,8,128], index: 0, kind: input, shape index: {}]   ;;  %s922_s1 = inlined_call_operand.hbm [shape: f32[2,1,8,128], index: 1, kind: input, shape index: {}]   ;;  %s923_s2 = inlined_call_operand.hbm [shape: f32[2,8,128], index: 2, kind: output, shape index: {0}]   ;;  %s924_s3 = inlined_call_operand.hbm [shape: f32[2,8,128], index: 3, kind: output, shape index: {1}]  }
   0x1   :  { %11 = vsyncpa [#allocation3 + $0x1], 0 }
   0x2   :  { %12 = vsyncpa [#allocation6], 0 }
   0x3   :  { %14 = vsyncpa [#allocation6 + $0x1], 0 }
   0x4   :  { %15 = vsyncpa [#allocation4], 0 }
   0x5   :  { %17 = vsyncpa [#allocation4 + $0x1], 0 }
   0x6   :  { %18 = vsyncpa [#allocation9], 0 }
   0x7   :  { %20 = vsyncpa [#allocation9 + $0x1], 0  ;;  %s761_s12 = smov 0   ;;  %s763_s13 = smov 0  }
   0x8   :  { %s765_s14 = smov 0   ;;  %s767_s15 = smov 0  }
   0x9   :  { %s769_s16 = smov 0   ;;  %s771_s17 = smov 0  }
   0xa LB: > { %s464_s18 = sadd.s32 4294967295, %s739_s17   ;;  %s465_s19 = sadd.s32 4294967294, %s739_s17   ;;  %s739_s17 = sphi %s771_s17, %s26_s17   ;;  %s735_s16 = sphi %s769_s16, %s933_s16   ;;  %s731_s15 = sphi %s767_s15, %s932_s15   ;;  %s727_s14 = sphi %s765_s14, %s931_s14   ;;  %s723_s13 = sphi %s763_s13, %s930_s13   ;;  %s719_s12 = sphi %s761_s12, %s929_s12  }
   0xb   : > { %s38_s20 = sadd.s32 1, %s735_s16  ;;  %s47_s21 = sadd.s32 1, %s727_s14 }
   0xc   : > { %p40_p0 = scmp.ge.s32.totalorder %s38_s20, 2  ;;  %p54_p1 = scmp.ne.s32.totalorder %s727_s14, %s723_s13 }
   0xd   : > { %p55_p2 = scmp.eq.s32.totalorder %s739_s17, 0  ;;  %p60_p3 = scmp.ne.s32.totalorder %s723_s13, %s719_s12 }
   0xe   : > { %s935_s20 = smov (%p40_p0, %s38_s20), 0  ;;  %p61_p5 = scmp.eq.s32.totalorder %s464_s18, 0 }
   0xf   : > { %p802_p4 = por %p55_p2, %p54_p1  ;;  %s42_s23 = ssub.s32 %s735_s16, %s935_s20 }
  0x10   : > { %p112_p6 = scmp.eq.s32.totalorder %s464_s18, 1  ;;  %p45_p7 = scmp.eq.s32.totalorder %s42_s23, 0 }
  0x11   : > { %p808_p8 = por %p61_p5, %p60_p3  ;;  %p118_p10 = scmp.eq.s32.totalorder %s465_s19, 1 }
  0x12   : > { %p812_p9 = por %p112_p6, %p54_p1  ;;  %p467_p12 = scmp.ge.s32.totalorder %s739_s17, 2 }
  0x13   : > { %s817_s26 = scalar_select %p45_p7, %s727_s14, %s47_s21  }
  0x14   : > { %p819_p11 = por %p118_p10, %p60_p3  ;;  %p506_p13 = scmp.lt.s32.totalorder %s739_s17, 2 }
  0x15   : > { %s164_s28 = sand.u32 1, %s727_s14   ;;  %s469_s30 = sshll.u32 %s735_s16, 3 }
  0x16   : > { %s468_s29 = sshll.u32 %s164_s28, 3  ;;  %s173_s6 = scalar_lea.hbm %s921_s0, %s469_s30 }
  0x17   : > { %s168_s7 = scalar_lea.vmem [#allocation2], %s468_s29  ;;  %s175_s9 = sshll.u32 %s173_s6, 4  ;;  %s176_s9 = int_to_ptr.hbm [resolvable:$true] %s175_s9 }
  0x18   : > { %s177_s8 = sshll.u32 %s168_s7, 4  ;;  %p493_p0 = pnand %p506_p13, %p802_p4  ;;  %s178_s8 = int_to_ptr.vmem [resolvable:$true] %s177_s8 }
  0x19   : > { %p472_p1 = scmp.ge.s32.totalorder %s739_s17, 1  ;;  %p202_p2 = scmp.lt.s32.totalorder %s739_s17, 3 }
  0x1a   : > { %s165_s10 = scalar_lea.sflag [#allocation3], %s164_s28  ;;  %s193_s19 = scalar_lea.hbm %s922_s1, %s469_s30 }
  0x1b   : > { %495 = dma.hbm_to_vmem [thread:$0]  (!%p493_p0), %s176_s9, 128, %s178_s8, %s165_s10  }
  0x1c   : > { %p203_p3 = pnand %p472_p1, %p202_p2  ;;  %s188_s21 = scalar_lea.vmem [#allocation5], %s468_s29 }
  0x1d   : > { %s197_s23 = sshll.u32 %s188_s21, 4  ;;  %s195_s4 = sshll.u32 %s193_s19, 4  ;;  %s198_s23 = int_to_ptr.vmem [resolvable:$true] %s197_s23  ;;  %s196_s4 = int_to_ptr.hbm [resolvable:$true] %s195_s4 }
  0x1e   : > { %s185_s5 = scalar_lea.sflag [#allocation6], %s164_s28  ;;  %206 = sbr.rel (%p203_p3) target bundleno = 85 (0x55), region = 28 }
  0x1f   : > { %498 = dma.hbm_to_vmem [thread:$0]  (!%p493_p0), %s196_s4, 128, %s198_s23, %s185_s5  }
  0x20   : > { %s838_s22 = sand.u32 (!%p203_p3), 1, %s723_s13  }
  0x21   : > { %s841_s6 = sshll.u32 (!%p203_p3), %s838_s22, 3  ;;  %s209_s7 = scalar_lea.sflag (!%p203_p3), [#allocation3], %s838_s22 }
  0x22   : > { %s212_s8 = scalar_lea.vmem (!%p203_p3), [#allocation2], %s841_s6 }
  0x23   : > { %702 = dma.done.wait (%p808_p8), %s209_s7, 128  }
  0x24   : > { %704 = vsyncadd (%p808_p8), %s209_s7, 4294967168  ;;  %s219_s28 = scalar_lea.sflag [#allocation6], %s838_s22  ;;  %s222_s29 = scalar_lea.vmem [#allocation5], %s841_s6 }
  0x25   : > { %706 = dma.done.wait (%p808_p8), %s219_s28, 128  }
  0x26   : > { %708 = vsyncadd (%p808_p8), %s219_s28, 4294967168  ;;  %v262_v0 = vld [vmem:[%s212_s8] sm:$0xff]  ;;  %s480_s30 = sshll.u32 %s731_s15, 3  ;;  %v263_v12 = vld [vmem:[%s222_s29] sm:$0xff]  ;;  %s248_s21 = scalar_lea.vmem [#allocation7], %s841_s6 }
  0x27   : > { %v477_v1 = vmul.f32 -1.442695, %v262_v0  ;;  %s309_s10 = scalar_lea.hbm %s923_s2, %s480_s30  ;;  %s323_s19 = scalar_lea.hbm %s924_s3, %s480_s30 }
  0x28   : > { %s863_s23 = sshll.u32 %s248_s21, 4  ;;  %s313_s15 = sshll.u32 %s309_s10, 4  ;;  %s312_s23 = int_to_ptr.vmem [resolvable:$true] %s863_s23  ;;  %s314_s15 = int_to_ptr.hbm [resolvable:$true] %s313_s15 }
  0x29   : > { %557 = vpow2.f32 %v477_v1  ;;  %s255_s4 = scalar_lea.vmem [#allocation8], %s841_s6  ;;  %s327_s7 = sshll.u32 %s323_s19, 4  ;;  %s870_s7 = int_to_ptr.hbm [resolvable:$true] %s327_s7 }
  0x2a   : > { %s866_s5 = sshll.u32 %s255_s4, 4  ;;  %s294_s8 = scalar_lea.sflag [#allocation4], %s838_s22  ;;  %s326_s5 = int_to_ptr.vmem [resolvable:$true] %s866_s5 }
  0x2b   : > { %s635_s28 = sshra.s32 %s314_s15, 4  ;;  %s641_s24 = scalar_lea.hbm %s923_s2, 16  ;;  %s636_s28 = int_to_ptr.hbm [resolvable:$true] %s635_s28 }
  0x2c   : > { %s637_s29 = scalar_lea.hbm %s636_s28, 8  ;;  %p642_p7 = scmp.lt.s32.totalorder %s636_s28, %s923_s2 }
  0x2d   : > { %p638_p4 = scmp.ne.s32.totalorder %s636_s28, %s637_s29  ;;  %p643_p8 = scmp.lt.s32.totalorder %s641_s24, %s637_s29 }
  0x2f   : > { %v558_v2 = vpop.eup %557  ;;  %p639_p5 = pnand %p638_p4, %p812_p9  ;;  %p644_p10 = por %p643_p8, %p642_p7 }
  0x30   : > { %v267_v3 = vadd.f32 1.0, %v558_v2 }
  0x31   : > { %p640_p6 = pneg %p639_p5 }
  0x32   : > { %559 = vrcp.f32 %v267_v3  ;;  %v279_v6 = vand.u32 2147483648, %v267_v3  ;;  %vm273_vm0 = vweird.f32 %v267_v3  ;;  %v277_v8 = vand.u32 2147483647, %v267_v3 }
  0x33   : > { %p645_p13 = pnand %p644_p10, %p640_p6 }
  0x34   : > { %v280_v10 = vor.u32 1.1754944e-38, %v279_v6  ;;  %vm278_vm3 = vcmp.eq.f32.partialorder %v277_v8, 8.507059e+37 }
  0x38   : > { %v560_v4 = vpop.eup %559 }
  0x39   : > { %v269_v5 = vmul.f32 %v560_v4, %v267_v3  ;;  %vm274_vm1 = vweird.f32 %v560_v4 }
  0x3a   : > { %vm275_vm2 = vmor %vm273_vm0, %vm274_vm1 }
  0x3b   : > { %v270_v7 = vsub.f32 1.0, %v269_v5 }
  0x3d   : > { %v271_v9 = vmul.f32 %v560_v4, %v270_v7 }
  0x3f   : > { %v272_v11 = vadd.f32 %v560_v4, %v271_v9 }
  0x41   : > { %v276_v13 = vsel %vm275_vm2, %v560_v4, %v272_v11 }
  0x42   : > { %v281_v14 = vsel %vm278_vm3, %v280_v10, %v276_v13 }
  0x43   : > { %v284_v15 = vmul.f32 %v281_v14, %v263_v12  ;;  %v289_v16 = vadd.f32 %v281_v14, %v263_v12 }
  0x45   : > { %287 = vst [vmem:[%s248_s21] sm:$0xff] %v284_v15 }
  0x46   : > { %292 = vst [vmem:[%s255_s4] sm:$0xff] %v289_v16 }
  0x47   : > { %648 = shalt.err (!%p645_p13)
}
  0x48   : > { %488 = dma.vmem_to_hbm [thread:$0]  (%p812_p9), %s312_s23, 128, %s314_s15, %s294_s8  }
  0x49   : > { %s299_s11 = scalar_lea.sflag [#allocation9], %s838_s22  ;;  %s663_s18 = sshra.s32 %s870_s7, 4  ;;  %s664_s18 = int_to_ptr.hbm [resolvable:$true] %s663_s18 }
  0x4a   : > { %s665_s19 = scalar_lea.hbm %s664_s18, 8  ;;  %s669_s28 = scalar_lea.hbm %s924_s3, 16 }
  0x4b   : > { %p666_p0 = scmp.ne.s32.totalorder %s664_s18, %s665_s19  ;;  %p670_p3 = scmp.lt.s32.totalorder %s664_s18, %s924_s3 }
  0x4c   : > { %p671_p4 = scmp.lt.s32.totalorder %s669_s28, %s665_s19 }
  0x4d   : > { %p667_p1 = pnand %p666_p0, %p812_p9 }
  0x4e   : > { %p672_p5 = por %p671_p4, %p670_p3 }
  0x4f   : > { %p668_p2 = pneg %p667_p1 }
  0x51   : > { %p673_p6 = pnand %p672_p5, %p668_p2 }
  0x53   : > { %676 = shalt.err (!%p673_p6)
}
  0x54   : > { %489 = dma.vmem_to_hbm [thread:$0]  (%p812_p9), %s326_s5, 128, %s870_s7, %s299_s11  }
  0x55 PF: > { %s339_s22 = sand.u32 1, %s719_s12   ;;  %p500_p7 = pnand %p467_p12, %p819_p11 }
  0x56   : > { %s340_s23 = scalar_lea.sflag [#allocation4], %s339_s22 }
  0x57   : > { %p501_p8 = pneg %p500_p7 }
  0x59   : > { %710 = dma.done.wait (%p501_p8), %s340_s23, 128  }
  0x5a   : > { %712 = vsyncadd (%p501_p8), %s340_s23, 4294967168  ;;  %s350_s15 = scalar_lea.sflag [#allocation9], %s339_s22 }
  0x5b   : > { %714 = dma.done.wait (%p501_p8), %s350_s15, 128  }
  0x5c   : > { %716 = vsyncadd (%p501_p8), %s350_s15, 4294967168  ;;  %s26_s17 = sadd.s32 1, %s739_s17   ;;  %s929_s12 = smov %s723_s13 }
  0x5d   : > { %p23_p10 = scmp.ge.s32.totalorder %s26_s17, 4   ;;  %s930_s13 = smov %s727_s14 }
  0x5e   : > { %s931_s14 = smov %s817_s26  ;;  %s932_s15 = smov %s735_s16 }
  0x5f   : > { %s933_s16 = smov %s935_s20  ;;  %25 = sbr.rel (!%p23_p10) target bundleno = 10 (0xa), region = 107 }
  0x64   :  { %356 = vsyncpa [#allocation3], 1 }
  0x65   :  { %358 = vsyncpa [#allocation3 + $0x1], 1 }
  0x66   :  { %359 = vsyncpa [#allocation6], 1 }
  0x67   :  { %361 = vsyncpa [#allocation6 + $0x1], 1 }
  0x68   :  { %362 = vsyncpa [#allocation4], 1 }
  0x69   :  { %364 = vsyncpa [#allocation4 + $0x1], 1 }
  0x6a   :  { %365 = vsyncpa [#allocation9], 1 }
  0x6b   :  { %367 = vsyncpa [#allocation9 + $0x1], 1 }

</bundles_post_ra>
